<compile_context>
chip_gen: v6e
topology: v6e:2x2x1
jax: 0.10.0
libtpu: 0.0.40
codegen_flags: <defaults>
</compile_context>

<pallas_src>
import functools

import jax
import jax.numpy as jnp
from jax import lax
from jax.experimental import pallas as pl
from jax.experimental.pallas import tpu as pltpu


def _bsa_kernel(coords_ref, grid_ref, guide_ref, image_ref, out_ref, wxy_ref, *,
                cin, cout, gd, gh, gw, tp):
    f32 = jnp.float32
    c = (cin + 1) * cout            # affine-coefficient channels; rows ordered ci*Cout + co

    # ---- guide-independent spatial tent weights: computed once per pixel tile (first
    #      batch step) and cached in VMEM scratch across the inner "arbitrary" batch axis.
    @pl.when(pl.program_id(1) == 0)
    def _():
        coords = coords_ref[...].astype(f32)                      # [2, TP]
        cgx = coords[0:1, :]                                       # clamped to [0.5, GW-0.5]
        cgy = coords[1:2, :]                                       # clamped to [0.5, GH-0.5]
        # Direct clamped tent: exactly equivalent to the reference 2-corner accumulate
        # for the un-smoothed x/y tents.
        ix = lax.broadcasted_iota(jnp.int32, (gw, 1), 0).astype(f32) + 0.5
        iy = lax.broadcasted_iota(jnp.int32, (gh, 1), 0).astype(f32) + 0.5
        wx = jnp.maximum(1.0 - jnp.abs(ix - cgx), 0.0)             # [GW, TP]
        wy = jnp.maximum(1.0 - jnp.abs(iy - cgy), 0.0)             # [GH, TP]
        wxy_ref[...] = (wy[:, None, :] * wx[None, :, :]).reshape(gh * gw, tp)

    g2 = grid_ref[0].astype(f32)        # [C*GD, GH*GW]  rows = (ci*Cout + co)*GD + d
    guide = guide_ref[0].astype(f32)    # [1, TP]        (lane-dense)
    img = image_ref[0].astype(f32)      # [Cin, TP]

    # ---- smoothed depth tent (2-corner accumulate, matches the CUDA weight_z) ----
    gz = guide * float(gd)                                          # [1, TP]
    zc = lax.broadcasted_iota(jnp.int32, (gd, 1), 0).astype(f32)    # [GD, 1]
    fz = jnp.floor(gz - 0.5)
    wz = jnp.zeros((gd, tp), f32)
    for k in (0.0, 1.0):
        zz = fz + k
        dz = zz + 0.5 - gz
        wt = jnp.maximum(1.0 - jnp.sqrt(dz * dz + 1e-8), 0.0)       # [1, TP]
        wz = wz + wt * (zc == jnp.clip(zz, 0.0, float(gd - 1))).astype(f32)   # [GD, TP]

    # ---- one MXU matmul slices every (coeff channel, depth) at once: [C*GD, TP] ----
    coeff_d = jnp.dot(g2, wxy_ref[...], preferred_element_type=f32)

    # ---- depth reduction (VPU/XLU): coeff_z[c] = sum_d coeff_d[c*GD + d] * wz[d] ----
    coeff_z = jnp.sum(coeff_d.reshape(c, gd, tp) * wz[None, :, :], axis=1)    # [C, TP]

    # ---- affine apply: out[co] = sum_ci coeff_z[ci*Cout+co]*img[ci] + coeff_z[Cin*Cout+co]
    out = coeff_z[cin * cout:(cin + 1) * cout, :]                   # offset term, [Cout, TP]
    for ci in range(cin):
        out = out + coeff_z[ci * cout:(ci + 1) * cout, :] * img[ci:ci + 1, :]
    out_ref[0] = out.astype(out_ref.dtype)                          # [Cout, TP]


def bilateral_slice_apply(grid, guide, image, *, tile_pixels=8192):
    """Forward of BilateralSliceApply (has_offset=True).

    tile_pixels: pixel-tile size (multiple of 128). 8192 is a good default on every
    generation; v5e/v6e (128 MiB VMEM) can go to 16384, keep <= 8192 on v7x (64 MiB).
    """
    B, C, GD, GH, GW = grid.shape
    _, _, H, W = guide.shape
    _, Cin, _, _ = image.shape
    Cout = C // (Cin + 1)
    assert C == (Cin + 1) * Cout, "grid channels must be (Cin+1)*Cout"
    assert tile_pixels >= 128

    P = H * W
    GHW = GH * GW
    CGD = C * GD

    # Pixel tile: multiple of 128, no bigger than the (rounded-up) pixel count.
    TP = min(tile_pixels, pl.cdiv(P, 128) * 128)
    TP = max(128, (TP // 128) * 128)
    if B == 1:
        # Ensure >= 2 grid steps so both TensorCores (v7x megacore) get work.
        TP = min(TP, max(128, pl.cdiv(pl.cdiv(P, 2), 128) * 128))
    P_pad = pl.cdiv(P, TP) * TP
    num_pt = P_pad // TP

    # Glue reshapes (plain JAX): lane-dense per-batch views. Coefficient channels are
    # reordered to (ci, co) so the in-kernel affine apply uses contiguous row slices.
    grid_f = grid.reshape(B, Cout, Cin + 1, GD, GHW)
    grid_f = jnp.transpose(grid_f, (0, 2, 1, 3, 4)).reshape(B, CGD, GHW)
    guide_f = guide.reshape(B, 1, P)                   # pixels on the lane axis
    image_f = image.reshape(B, Cin, P)

    # Batch-invariant, pre-clamped x/y grid centers (removes per-lane int div/mod).
    xs = jnp.arange(W, dtype=jnp.float32)
    ys = jnp.arange(H, dtype=jnp.float32)
    cgx = jnp.clip((xs + 0.5) * (GW / W), 0.5, GW - 0.5)
    cgy = jnp.clip((ys + 0.5) * (GH / H), 0.5, GH - 0.5)
    coords = jnp.stack([
        jnp.broadcast_to(cgx[None, :], (H, W)).reshape(P),
        jnp.broadcast_to(cgy[:, None], (H, W)).reshape(P)], axis=0)   # [2, P]

    if P_pad != P:
        pad = P_pad - P
        guide_f = jnp.pad(guide_f, ((0, 0), (0, 0), (0, pad)))
        image_f = jnp.pad(image_f, ((0, 0), (0, 0), (0, pad)))
        coords = jnp.pad(coords, ((0, 0), (0, pad)))

    kernel = functools.partial(_bsa_kernel, cin=Cin, cout=Cout,
                               gd=GD, gh=GH, gw=GW, tp=TP)

    # VMEM budget: double-buffered IO blocks + cached wxy scratch + the [CGD, TP] slice
    # result and its depth-weighted product. Never below the 32 MiB scoped default and
    # never close to v7x's 64 MiB physical VMEM.
    io_bytes = 2 * 4 * (CGD * GHW + (2 + 1 + Cin + Cout) * TP)
    live_bytes = 4 * TP * (GHW + 2 * CGD + GD + C + 16)
    vmem_limit = int(min(max(32 * 1024 * 1024, (io_bytes + live_bytes) * 3 // 2),
                         56 * 1024 * 1024))

    out_f = pl.pallas_call(
        kernel,
        out_shape=jax.ShapeDtypeStruct((B, Cout, P_pad), image.dtype),
        grid=(num_pt, B),            # pixel tiles outer ("parallel"), batch inner ("arbitrary")
        in_specs=[
            # Clamped centers: batch-invariant, stays resident across the inner batch axis.
            pl.BlockSpec((2, TP), lambda p, b: (0, p)),
            # Bilateral grid: small (CGD*GHW*4 bytes) block, re-fetched per batch step.
            pl.BlockSpec((1, CGD, GHW), lambda p, b: (b, 0, 0)),
            pl.BlockSpec((1, 1, TP), lambda p, b: (b, 0, p)),
            pl.BlockSpec((1, Cin, TP), lambda p, b: (b, 0, p)),
        ],
        out_specs=pl.BlockSpec((1, Cout, TP), lambda p, b: (b, 0, p)),
        scratch_shapes=[pltpu.VMEM((GHW, TP), jnp.float32)],       # cached wxy
        compiler_params=pltpu.CompilerParams(
            dimension_semantics=("parallel", "arbitrary"),
            vmem_limit_bytes=vmem_limit),
        cost_estimate=pl.CostEstimate(
            flops=2 * B * CGD * GHW * P_pad,
            transcendentals=2 * B * P_pad,
            bytes_accessed=4 * (B * (1 + Cin + Cout) * P_pad
                                + B * num_pt * CGD * GHW + 2 * P_pad)),
    )(coords, grid_f, guide_f, image_f)

    return out_f[:, :, :P].reshape(B, Cout, H, W)


def _reference(grid, guide, image):
    """Pure-JAX reference of the CUDA bilateral_slice_apply forward."""
    B, C, GD, GH, GW = grid.shape
    _, _, H, W = guide.shape
    _, Cin, _, _ = image.shape
    Cout = C // (Cin + 1)

    y = jnp.arange(H, dtype=jnp.float32)[:, None]
    x = jnp.arange(W, dtype=jnp.float32)[None, :]
    gx = jnp.broadcast_to((x + 0.5) * GW / W, (H, W))
    gy = jnp.broadcast_to((y + 0.5) * GH / H, (H, W))
    fx = jnp.floor(gx - 0.5)
    fy = jnp.floor(gy - 0.5)

    def one(gr, gdm, im):
        gz = gdm * GD
        fz = jnp.floor(gz - 0.5)
        coeff = jnp.zeros((C, H, W), jnp.float32)
        for dx in (0, 1):
            xx = fx + dx
            wx = jnp.maximum(1.0 - jnp.abs(xx + 0.5 - gx), 0.0)
            xi = jnp.clip(xx, 0, GW - 1).astype(jnp.int32)
            for dy in (0, 1):
                yy = fy + dy
                wy = jnp.maximum(1.0 - jnp.abs(yy + 0.5 - gy), 0.0)
                yi = jnp.clip(yy, 0, GH - 1).astype(jnp.int32)
                for dz in (0, 1):
                    zz = fz + dz
                    dzz = zz + 0.5 - gz
                    wz = jnp.maximum(1.0 - jnp.sqrt(dzz * dzz + 1e-8), 0.0)
                    zi = jnp.clip(zz, 0, GD - 1).astype(jnp.int32)
                    samp = gr[:, zi, yi, xi]               # [C, H, W]
                    coeff = coeff + (wx * wy * wz)[None] * samp
        cs = Cin + 1
        outs = []
        for co in range(Cout):
            acc = coeff[co * cs + Cin]
            for ci in range(Cin):
                acc = acc + coeff[co * cs + ci] * im[ci]
            outs.append(acc)
        return jnp.stack(outs, axis=0)

    return jax.vmap(one)(grid, guide[:, 0], image)


if __name__ == "__main__":
    key = jax.random.PRNGKey(0)
    B, Cin, H, W = 2, 3, 16, 16
    GD, GH, GW = 8, 8, 8
    Cout = Cin
    C = (Cin + 1) * Cout          # 12 affine coefficients

    k1, k2, k3 = jax.random.split(key, 3)
    grid = jax.random.normal(k1, (B, C, GD, GH, GW), dtype=jnp.float32)
    guide = jax.random.uniform(k2, (B, 1, H, W), dtype=jnp.float32)
    image = jax.random.uniform(k3, (B, Cin, H, W), dtype=jnp.float32)

    out = bilateral_slice_apply(grid, guide, image)
    jax.block_until_ready(out)
    ref = _reference(grid, guide, image)
    assert out.shape == (B, Cout, H, W)
    assert jnp.allclose(out, ref, atol=1e-4, rtol=1e-4)

    # Second config: ragged pixel count (padding) + multiple pixel tiles per batch.
    H2, W2 = 18, 14
    g2k, gu2k, im2k = jax.random.split(jax.random.PRNGKey(1), 3)
    grid2 = jax.random.normal(g2k, (B, C, GD, GH, GW), dtype=jnp.float32)
    guide2 = jax.random.uniform(gu2k, (B, 1, H2, W2), dtype=jnp.float32)
    image2 = jax.random.uniform(im2k, (B, Cin, H2, W2), dtype=jnp.float32)
    out2 = bilateral_slice_apply(grid2, guide2, image2, tile_pixels=128)
    jax.block_until_ready(out2)
    ref2 = _reference(grid2, guide2, image2)
    assert out2.shape == (B, Cout, H2, W2)
    assert jnp.allclose(out2, ref2, atol=1e-4, rtol=1e-4)

    # Third config: B == 1 exercises the automatic pixel-tile split (>= 2 grid steps).
    g3k, gu3k, im3k = jax.random.split(jax.random.PRNGKey(2), 3)
    grid3 = jax.random.normal(g3k, (1, C, GD, GH, GW), dtype=jnp.float32)
    guide3 = jax.random.uniform(gu3k, (1, 1, H, W), dtype=jnp.float32)
    image3 = jax.random.uniform(im3k, (1, Cin, H, W), dtype=jnp.float32)
    out3 = bilateral_slice_apply(grid3, guide3, image3)
    jax.block_until_ready(out3)
    ref3 = _reference(grid3, guide3, image3)
    assert out3.shape == (1, Cout, H, W)
    assert jnp.allclose(out3, ref3, atol=1e-4, rtol=1e-4)

    print("KERNEL_OK")
</pallas_src>

<mosaic_0001>
module attributes {stable_mosaic.version = 11 : i64} {
  func.func @_bsa_kernel(%arg0: i32, %arg1: i32, %arg2: memref<2x256xf32, #tpu.memory_space<vmem>>, %arg3: memref<1x96x64xf32, #tpu.memory_space<vmem>>, %arg4: memref<1x1x256xf32, #tpu.memory_space<vmem>>, %arg5: memref<1x3x256xf32, #tpu.memory_space<vmem>>, %arg6: memref<1x3x256xf32, #tpu.memory_space<vmem>>, %arg7: memref<64x256xf32, #tpu.memory_space<vmem>>) attributes {dimension_semantics = [#tpu.dimension_semantics<parallel>, #tpu.dimension_semantics<arbitrary>], iteration_bounds = array<i64: 1, 2>, scalar_prefetch = 0 : i64, scratch_operands = 1 : i64, tpu.core_type = #tpu.core_type<tc>, window_params = [{transform_indices = @transform_0, window_bounds = array<i64: 2, 256>}, {transform_indices = @transform_1, window_bounds = array<i64: 1, 96, 64>}, {transform_indices = @transform_2, window_bounds = array<i64: 1, 1, 256>}, {transform_indices = @transform_3, window_bounds = array<i64: 1, 3, 256>}, {transform_indices = @transform_4, window_bounds = array<i64: 1, 3, 256>}]} {
    %c0_i32 = arith.constant 0 : i32
    %0 = arith.cmpi eq, %arg1, %c0_i32 : i32
    %1 = arith.extui %0 : i1 to i32
    %c0_i32_0 = arith.constant 0 : i32
    %2 = arith.cmpi ne, %1, %c0_i32_0 : i32
    scf.if %2 {
      %c0_32 = arith.constant 0 : index
      %c0_33 = arith.constant 0 : index
      %93 = vector.load %arg2[%c0_32, %c0_33] : memref<2x256xf32, #tpu.memory_space<vmem>>, vector<2x256xf32>
      %94 = vector.extract_strided_slice %93 {offsets = [0, 0], sizes = [1, 256], strides = [1, 1]} : vector<2x256xf32> to vector<1x256xf32>
      %95 = vector.extract_strided_slice %93 {offsets = [1, 0], sizes = [1, 256], strides = [1, 1]} : vector<2x256xf32> to vector<1x256xf32>
      %96 = tpu.iota {dimensions = array<i32: 0>} : vector<8x1xi32>
      %97 = arith.sitofp %96 : vector<8x1xi32> to vector<8x1xf32>
      %cst_34 = arith.constant 5.000000e-01 : f32
      %98 = vector.broadcast %cst_34 : f32 to vector<8x1xf32>
      %99 = arith.addf %97, %98 : vector<8x1xf32>
      %100 = tpu.iota {dimensions = array<i32: 0>} : vector<8x1xi32>
      %101 = arith.sitofp %100 : vector<8x1xi32> to vector<8x1xf32>
      %cst_35 = arith.constant 5.000000e-01 : f32
      %102 = vector.broadcast %cst_35 : f32 to vector<8x1xf32>
      %103 = arith.addf %101, %102 : vector<8x1xf32>
      %104 = vector.broadcast %99 : vector<8x1xf32> to vector<8x256xf32>
      %105 = vector.broadcast %94 : vector<1x256xf32> to vector<8x256xf32>
      %106 = arith.subf %104, %105 : vector<8x256xf32>
      %107 = math.absf %106 : vector<8x256xf32>
      %cst_36 = arith.constant 1.000000e+00 : f32
      %108 = vector.broadcast %cst_36 : f32 to vector<8x256xf32>
      %109 = arith.subf %108, %107 : vector<8x256xf32>
      %cst_37 = arith.constant 0.000000e+00 : f32
      %110 = vector.broadcast %cst_37 : f32 to vector<8x256xf32>
      %111 = arith.maximumf %109, %110 : vector<8x256xf32>
      %112 = vector.broadcast %103 : vector<8x1xf32> to vector<8x256xf32>
      %113 = vector.broadcast %95 : vector<1x256xf32> to vector<8x256xf32>
      %114 = arith.subf %112, %113 : vector<8x256xf32>
      %115 = math.absf %114 : vector<8x256xf32>
      %cst_38 = arith.constant 1.000000e+00 : f32
      %116 = vector.broadcast %cst_38 : f32 to vector<8x256xf32>
      %117 = arith.subf %116, %115 : vector<8x256xf32>
      %cst_39 = arith.constant 0.000000e+00 : f32
      %118 = vector.broadcast %cst_39 : f32 to vector<8x256xf32>
      %119 = arith.maximumf %117, %118 : vector<8x256xf32>
      %120 = vector.shape_cast %119 : vector<8x256xf32> to vector<8x1x256xf32>
      %121 = vector.shape_cast %111 : vector<8x256xf32> to vector<1x8x256xf32>
      %122 = vector.broadcast %120 : vector<8x1x256xf32> to vector<8x8x256xf32>
      %123 = vector.broadcast %121 : vector<1x8x256xf32> to vector<8x8x256xf32>
      %124 = arith.mulf %122, %123 : vector<8x8x256xf32>
      %125 = vector.shape_cast %124 : vector<8x8x256xf32> to vector<64x256xf32>
      %c0_40 = arith.constant 0 : index
      %c0_41 = arith.constant 0 : index
      %126 = vector.load %arg7[%c0_40, %c0_41] : memref<64x256xf32, #tpu.memory_space<vmem>>, vector<64x256xf32>
      tpu.vector_store %arg7[%c0_40, %c0_41], %125 {strides = array<i32>} : memref<64x256xf32, #tpu.memory_space<vmem>>, vector<64x256xf32>,
    } else {
    }
    %c0 = arith.constant 0 : index
    %c0_1 = arith.constant 0 : index
    %c0_2 = arith.constant 0 : index
    %3 = vector.load %arg3[%c0, %c0_1, %c0_2] : memref<1x96x64xf32, #tpu.memory_space<vmem>>, vector<1x96x64xf32>
    %4 = vector.shape_cast %3 : vector<1x96x64xf32> to vector<96x64xf32>
    %c0_3 = arith.constant 0 : index
    %c0_4 = arith.constant 0 : index
    %c0_5 = arith.constant 0 : index
    %5 = vector.load %arg4[%c0_3, %c0_4, %c0_5] : memref<1x1x256xf32, #tpu.memory_space<vmem>>, vector<1x1x256xf32>
    %6 = vector.shape_cast %5 : vector<1x1x256xf32> to vector<1x256xf32>
    %c0_6 = arith.constant 0 : index
    %c0_7 = arith.constant 0 : index
    %c0_8 = arith.constant 0 : index
    %7 = vector.load %arg5[%c0_6, %c0_7, %c0_8] : memref<1x3x256xf32, #tpu.memory_space<vmem>>, vector<1x3x256xf32>
    %8 = vector.shape_cast %7 : vector<1x3x256xf32> to vector<3x256xf32>
    %cst = arith.constant 8.000000e+00 : f32
    %9 = vector.broadcast %cst : f32 to vector<1x256xf32>
    %10 = arith.mulf %6, %9 : vector<1x256xf32>
    %11 = tpu.iota {dimensions = array<i32: 0>} : vector<8x1xi32>
    %12 = arith.sitofp %11 : vector<8x1xi32> to vector<8x1xf32>
    %cst_9 = arith.constant 5.000000e-01 : f32
    %13 = vector.broadcast %cst_9 : f32 to vector<1x256xf32>
    %14 = arith.subf %10, %13 : vector<1x256xf32>
    %15 = math.floor %14 : vector<1x256xf32>
    %cst_10 = arith.constant 0.000000e+00 : f32
    %16 = vector.broadcast %cst_10 : f32 to vector<8x256xf32>
    %cst_11 = arith.constant 0.000000e+00 : f32
    %17 = vector.broadcast %cst_11 : f32 to vector<1x256xf32>
    %18 = arith.addf %15, %17 : vector<1x256xf32>
    %cst_12 = arith.constant 5.000000e-01 : f32
    %19 = vector.broadcast %cst_12 : f32 to vector<1x256xf32>
    %20 = arith.addf %18, %19 : vector<1x256xf32>
    %21 = arith.subf %20, %10 : vector<1x256xf32>
    %22 = arith.mulf %21, %21 : vector<1x256xf32>
    %cst_13 = arith.constant 9.99999993E-9 : f32
    %23 = vector.broadcast %cst_13 : f32 to vector<1x256xf32>
    %24 = arith.addf %22, %23 : vector<1x256xf32>
    %25 = math.sqrt %24 : vector<1x256xf32>
    %cst_14 = arith.constant 1.000000e+00 : f32
    %26 = vector.broadcast %cst_14 : f32 to vector<1x256xf32>
    %27 = arith.subf %26, %25 : vector<1x256xf32>
    %cst_15 = arith.constant 0.000000e+00 : f32
    %28 = vector.broadcast %cst_15 : f32 to vector<1x256xf32>
    %29 = arith.maximumf %27, %28 : vector<1x256xf32>
    %cst_16 = arith.constant 0.000000e+00 : f32
    %cst_17 = arith.constant 7.000000e+00 : f32
    %30 = vector.broadcast %cst_16 : f32 to vector<1x256xf32>
    %31 = arith.maximumf %30, %18 : vector<1x256xf32>
    %32 = vector.broadcast %cst_17 : f32 to vector<1x256xf32>
    %33 = arith.minimumf %32, %31 : vector<1x256xf32>
    %34 = vector.broadcast %12 : vector<8x1xf32> to vector<8x256xf32>
    %35 = vector.broadcast %33 : vector<1x256xf32> to vector<8x256xf32>
    %36 = arith.cmpf oeq, %34, %35 : vector<8x256xf32>
    %37 = arith.extui %36 : vector<8x256xi1> to vector<8x256xi32>
    %38 = arith.sitofp %37 : vector<8x256xi32> to vector<8x256xf32>
    %39 = vector.broadcast %29 : vector<1x256xf32> to vector<8x256xf32>
    %40 = arith.mulf %39, %38 : vector<8x256xf32>
    %41 = arith.addf %16, %40 : vector<8x256xf32>
    %cst_18 = arith.constant 1.000000e+00 : f32
    %42 = vector.broadcast %cst_18 : f32 to vector<1x256xf32>
    %43 = arith.addf %15, %42 : vector<1x256xf32>
    %cst_19 = arith.constant 5.000000e-01 : f32
    %44 = vector.broadcast %cst_19 : f32 to vector<1x256xf32>
    %45 = arith.addf %43, %44 : vector<1x256xf32>
    %46 = arith.subf %45, %10 : vector<1x256xf32>
    %47 = arith.mulf %46, %46 : vector<1x256xf32>
    %cst_20 = arith.constant 9.99999993E-9 : f32
    %48 = vector.broadcast %cst_20 : f32 to vector<1x256xf32>
    %49 = arith.addf %47, %48 : vector<1x256xf32>
    %50 = math.sqrt %49 : vector<1x256xf32>
    %cst_21 = arith.constant 1.000000e+00 : f32
    %51 = vector.broadcast %cst_21 : f32 to vector<1x256xf32>
    %52 = arith.subf %51, %50 : vector<1x256xf32>
    %cst_22 = arith.constant 0.000000e+00 : f32
    %53 = vector.broadcast %cst_22 : f32 to vector<1x256xf32>
    %54 = arith.maximumf %52, %53 : vector<1x256xf32>
    %cst_23 = arith.constant 0.000000e+00 : f32
    %cst_24 = arith.constant 7.000000e+00 : f32
    %55 = vector.broadcast %cst_23 : f32 to vector<1x256xf32>
    %56 = arith.maximumf %55, %43 : vector<1x256xf32>
    %57 = vector.broadcast %cst_24 : f32 to vector<1x256xf32>
    %58 = arith.minimumf %57, %56 : vector<1x256xf32>
    %59 = vector.broadcast %12 : vector<8x1xf32> to vector<8x256xf32>
    %60 = vector.broadcast %58 : vector<1x256xf32> to vector<8x256xf32>
    %61 = arith.cmpf oeq, %59, %60 : vector<8x256xf32>
    %62 = arith.extui %61 : vector<8x256xi1> to vector<8x256xi32>
    %63 = arith.sitofp %62 : vector<8x256xi32> to vector<8x256xf32>
    %64 = vector.broadcast %54 : vector<1x256xf32> to vector<8x256xf32>
    %65 = arith.mulf %64, %63 : vector<8x256xf32>
    %66 = arith.addf %41, %65 : vector<8x256xf32>
    %c0_25 = arith.constant 0 : index
    %c0_26 = arith.constant 0 : index
    %67 = vector.load %arg7[%c0_25, %c0_26] : memref<64x256xf32, #tpu.memory_space<vmem>>, vector<64x256xf32>
    %cst_27 = arith.constant dense<0.000000e+00> : vector<96x256xf32>
    %68 = tpu.matmul %4, %67, %cst_27 {dimension_numbers = #tpu.dot_dimension_numbers<[1], [0], [0], [1], [0, 0, 1, 1], [], []>} : vector<96x64xf32>, vector<64x256xf32>, vector<96x256xf32> -> vector<96x256xf32>
    %69 = vector.shape_cast %68 : vector<96x256xf32> to vector<12x8x256xf32>
    %70 = vector.shape_cast %66 : vector<8x256xf32> to vector<1x8x256xf32>
    %71 = vector.broadcast %70 : vector<1x8x256xf32> to vector<12x8x256xf32>
    %72 = arith.mulf %69, %71 : vector<12x8x256xf32>
    %cst_28 = arith.constant dense<0.000000e+00> : vector<12x256xf32>
    %73 = vector.multi_reduction <add>, %72, %cst_28 [1] : vector<12x8x256xf32> to vector<12x256xf32>
    %74 = vector.extract_strided_slice %73 {offsets = [9, 0], sizes = [3, 256], strides = [1, 1]} : vector<12x256xf32> to vector<3x256xf32>
    %75 = vector.extract_strided_slice %73 {offsets = [0, 0], sizes = [3, 256], strides = [1, 1]} : vector<12x256xf32> to vector<3x256xf32>
    %76 = vector.extract_strided_slice %8 {offsets = [0, 0], sizes = [1, 256], strides = [1, 1]} : vector<3x256xf32> to vector<1x256xf32>
    %77 = vector.broadcast %76 : vector<1x256xf32> to vector<3x256xf32>
    %78 = arith.mulf %75, %77 : vector<3x256xf32>
    %79 = arith.addf %74, %78 : vector<3x256xf32>
    %80 = vector.extract_strided_slice %73 {offsets = [3, 0], sizes = [3, 256], strides = [1, 1]} : vector<12x256xf32> to vector<3x256xf32>
    %81 = vector.extract_strided_slice %8 {offsets = [1, 0], sizes = [1, 256], strides = [1, 1]} : vector<3x256xf32> to vector<1x256xf32>
    %82 = vector.broadcast %81 : vector<1x256xf32> to vector<3x256xf32>
    %83 = arith.mulf %80, %82 : vector<3x256xf32>
    %84 = arith.addf %79, %83 : vector<3x256xf32>
    %85 = vector.extract_strided_slice %73 {offsets = [6, 0], sizes = [3, 256], strides = [1, 1]} : vector<12x256xf32> to vector<3x256xf32>
    %86 = vector.extract_strided_slice %8 {offsets = [2, 0], sizes = [1, 256], strides = [1, 1]} : vector<3x256xf32> to vector<1x256xf32>
    %87 = vector.broadcast %86 : vector<1x256xf32> to vector<3x256xf32>
    %88 = arith.mulf %85, %87 : vector<3x256xf32>
    %89 = arith.addf %84, %88 : vector<3x256xf32>
    %c0_29 = arith.constant 0 : index
    %c0_30 = arith.constant 0 : index
    %c0_31 = arith.constant 0 : index
    %90 = vector.load %arg6[%c0_29, %c0_30, %c0_31] : memref<1x3x256xf32, #tpu.memory_space<vmem>>, vector<1x3x256xf32>
    %91 = vector.shape_cast %90 : vector<1x3x256xf32> to vector<3x256xf32>
    %92 = vector.shape_cast %89 : vector<3x256xf32> to vector<1x3x256xf32>
    tpu.vector_store %arg6[%c0_29, %c0_30, %c0_31], %92 {strides = array<i32>} : memref<1x3x256xf32, #tpu.memory_space<vmem>>, vector<1x3x256xf32>,
    return
  }
  func.func @transform_0(%arg0: i32, %arg1: i32) -> (i32, i32) {
    %c0_i32 = arith.constant 0 : i32
    %c0_i32_0 = arith.constant 0 : i32
    return %c0_i32, %arg0 : i32, i32
  }
  func.func @transform_1(%arg0: i32, %arg1: i32) -> (i32, i32, i32) {
    %c0_i32 = arith.constant 0 : i32
    %c0_i32_0 = arith.constant 0 : i32
    %c0_i32_1 = arith.constant 0 : i32
    return %arg1, %c0_i32, %c0_i32_0 : i32, i32, i32
  }
  func.func @transform_2(%arg0: i32, %arg1: i32) -> (i32, i32, i32) {
    %c0_i32 = arith.constant 0 : i32
    %c0_i32_0 = arith.constant 0 : i32
    return %arg1, %c0_i32, %arg0 : i32, i32, i32
  }
  func.func @transform_3(%arg0: i32, %arg1: i32) -> (i32, i32, i32) {
    %c0_i32 = arith.constant 0 : i32
    %c0_i32_0 = arith.constant 0 : i32
    return %arg1, %c0_i32, %arg0 : i32, i32, i32
  }
  func.func @transform_4(%arg0: i32, %arg1: i32) -> (i32, i32, i32) {
    %c0_i32 = arith.constant 0 : i32
    %c0_i32_0 = arith.constant 0 : i32
    return %arg1, %c0_i32, %arg0 : i32, i32, i32
  }
}

</mosaic_0001>

<bundles_post_ra>
// kernel: tpu_custom_call.1
= control target key start
LH: loop header
LB: loop body
LE: loop exit
PB: predicated region body
PF: predicated region fallthrough
CT: control target
= control target key end

     0   :  { %s1385_s15 = smov 0   ;;  %s1387_s16 = smov 0   ;;  %s1634_s0 = inlined_call_operand.vmem [shape: f32[2,256], index: 0, kind: input, shape index: {}]   ;;  %s1635_s1 = inlined_call_operand.vmem [shape: f32[2,96,64], index: 1, kind: input, shape index: {}]   ;;  %s1636_s2 = inlined_call_operand.vmem [shape: f32[2,1,256], index: 2, kind: input, shape index: {}]   ;;  %s1637_s3 = inlined_call_operand.vmem [shape: f32[2,3,256], index: 3, kind: input, shape index: {}]   ;;  %s1638_s4 = inlined_call_operand.vmem [shape: f32[2,3,256], index: 4, kind: output, shape index: {}]  }
   0x1   :  { %s1389_s17 = smov 0  }
   0x2 LB: > { %s23_s18 = sadd.s32 1, %s1352_s16  ;;  %p1258_p0 = scmp.ge.s32.totalorder %s1356_s17, 1  ;;  %s1356_s17 = sphi %s1389_s17, %s14_s17   ;;  %s1352_s16 = sphi %s1387_s16, %s1640_s16   ;;  %s1348_s15 = sphi %s1385_s15, %s1639_s15  }
   0x3   : > { %p24_p1 = scmp.ge.s32.totalorder %s23_s18, 2  ;;  %p220_p2 = scmp.lt.s32.totalorder %s1356_s17, 3 }
   0x5   : > { %s1642_s18 = smov (%p24_p1, %s23_s18), 0  ;;  %p221_p3 = pnand %p1258_p0, %p220_p2 }
   0x6   : > { %p278_p4 = scmp.lt.s32.totalorder (!%p221_p3), %s1348_s15, 1  ;;  %p1265_p5 = scmp.ne.s32.totalorder (!%p221_p3), %s1348_s15, 0 }
   0x7   : > { %224 = sbr.rel (%p221_p3) target bundleno = 341 (0x155), region = 36 }
   0xc   : > { %s279_s19 = scalar_select %p278_p4, %s1348_s15, 1 }
   0xd   : > { %315 = sbr.rel (%p1265_p5) target bundleno = 58 (0x3a), region = 40 }
   0xe   : > { %s1303_s20 = smul.u32 96, %s279_s19  ;;  %s1260_s21 = sshll.u32 %s279_s19, 1 }
   0xf   : > { %s1406_s24 = scalar_lea.vmem %s1636_s2, %s1260_s21  ;;  %s1285_s25 = sshll.u32 %s279_s19, 3 }
  0x10   : > { %s1411_s28 = scalar_lea.vmem %s1635_s1, %s1303_s20  ;;  %s1416_s5 = scalar_lea.vmem %s1637_s3, %s1285_s25 }
  0x11   : > { %s1421_s8 = scalar_lea.vmem %s1638_s4, %s1285_s25 }
  0x12   : > { %v317_v0 = vlaneseq  ;;  %v316_v2 = vld [vmem:[%s1634_s0] sm:$0xf]  ;;  %v1358_v17 = vmov 1966171168  }
  0x13   : > { %v379_v18 = vunpack.c.l.s4 %v1358_v17 }
  0x14   : > { %v318_v1 = vshrl.u32 %v317_v0, 7 }
  0x15   : > { %v380_v25 = vunpack.c.0.s8 %v379_v18 }
  0x16   : > { %v319_v3 = vcvt.s32.f32 %v318_v1  ;;  %v1426_v4 = vsub.s32 0, %v318_v1  ;;  %v328_v5 = vsub.s32 2, %v318_v1  ;;  %v1428_v6 = vsub.s32 1, %v318_v1 }
  0x17   : > { %v354_v7 = vsub.s32 3, %v318_v1  ;;  %v383_v32 = vsub.s32 %v380_v25, %v318_v1 }
  0x18   : > { %v320_v8 = vadd.f32 0.5, %v319_v3  ;;  %v325_v9 = vrot.slane %v316_v2, %v1426_v4  ;;  %v329_v10 = vrot.slane %v316_v2, %v328_v5  ;;  %v351_v11 = vrot.slane %v316_v2, %v1428_v6 }
  0x19   : > { %v355_v12 = vrot.slane %v316_v2, %v354_v7 }
  0x1a   : > { %v335_v13 = vrot.slane %v325_v9, %v1426_v4  ;;  %v339_v14 = vrot.slane %v329_v10, %v1426_v4  ;;  %v361_v15 = vrot.slane %v351_v11, %v1428_v6 }
  0x1b   : > { %v365_v16 = vrot.slane %v355_v12, %v1428_v6 }
  0x1c   : > { %v340_v19 = vsub.f32 %v320_v8, %v335_v13  ;;  %v341_v20 = vsub.f32 %v320_v8, %v339_v14  ;;  %v366_v21 = vsub.f32 %v320_v8, %v361_v15 }
  0x1d   : > { %v367_v22 = vsub.f32 %v320_v8, %v365_v16 }
  0x1e   : > { %v368_v23 = vand.u32 2147483647, %v366_v21  ;;  %v342_v26 = vand.u32 2147483647, %v340_v19  ;;  %v343_v27 = vand.u32 2147483647, %v341_v20 }
  0x1f   : > { %v369_v24 = vand.u32 2147483647, %v367_v22 }
  0x20   : > { %v370_v28 = vsub.f32 1.0, %v368_v23  ;;  %v344_v33 = vsub.f32 1.0, %v342_v26  ;;  %v345_v34 = vsub.f32 1.0, %v343_v27 }
  0x21   : > { %v371_v29 = vsub.f32 1.0, %v369_v24 }
  0x22   : > { %v372_v30 = vmax.f32 %v370_v28, 0.0  ;;  %v346_v39 = vmax.f32 %v344_v33, 0.0  ;;  %v347_v40 = vmax.f32 %v345_v34, 0.0 }
  0x23   : > { %v373_v31 = vmax.f32 %v371_v29, 0.0 }
  0x25   : > { %v376_v35 = vcombine.low %v372_v30, %v373_v31  ;;  %v377_v36 = vcombine.high %v372_v30, %v373_v31 }
  0x27   : > { %v384_v37 = vrot.slane %v376_v35, %v383_v32  ;;  %v391_v38 = vrot.slane %v377_v36, %v383_v32 }
  0x29   : > { %v400_v41 = vrot.slane %v384_v37, %v383_v32  ;;  %v392_v42 = vcombine.high %v384_v37, %v384_v37  ;;  %v407_v43 = vrot.slane %v391_v38, %v383_v32  ;;  %v393_v44 = vcombine.high %v391_v38, %v391_v38 }
  0x2b   : > { %v429_v45 = vrot.slane %v400_v41, %v1426_v4  ;;  %v433_v46 = vrot.slane %v400_v41, %v1428_v6  ;;  %v414_v47 = vrot.slane %v392_v42, %v383_v32  ;;  %v422_v48 = vcombine.high %v400_v41, %v400_v41 }
  0x2c   : > { %v461_v49 = vrot.slane %v407_v43, %v1426_v4  ;;  %v465_v50 = vrot.slane %v407_v43, %v1428_v6  ;;  %v421_v51 = vrot.slane %v393_v44, %v383_v32  ;;  %v423_v52 = vcombine.high %v407_v43, %v407_v43 }
  0x2d   : > { %v506_v53 = vmul.f32 %v429_v45, %v346_v39  ;;  %v507_v54 = vmul.f32 %v433_v46, %v347_v40  ;;  %v437_v55 = vrot.slane %v414_v47, %v1426_v4  ;;  %v441_v56 = vrot.slane %v414_v47, %v1428_v6 }
  0x2e   : > { %v445_v57 = vrot.slane %v422_v48, %v1426_v4  ;;  %v449_v58 = vrot.slane %v422_v48, %v1428_v6  ;;  %v424_v59 = vcombine.high %v414_v47, %v414_v47  ;;  %v514_v60 = vmul.f32 %v461_v49, %v346_v39 }
  0x2f   : > { %522 = vst [vmem:[#allocation2 + $0x30] sm:$0xff] %v506_v53  ;;  %523 = vst [vmem:[#allocation2] sm:$0xff] %v507_v54  ;;  %v508_v61 = vmul.f32 %v437_v55, %v346_v39  ;;  %v509_v62 = vmul.f32 %v441_v56, %v347_v40  ;;  %v515_v63 = vmul.f32 %v465_v50, %v347_v40 }
  0x30   : > { %v469_v0 = vrot.slane %v421_v51, %v1426_v4  ;;  %v510_v1 = vmul.f32 %v445_v57, %v346_v39  ;;  %v511_v2 = vmul.f32 %v449_v58, %v347_v40  ;;  %v453_v3 = vrot.slane %v424_v59, %v1426_v4  ;;  %530 = vst [vmem:[#allocation2 + $0x40] sm:$0xff] %v514_v60 }
  0x31   : > { %v457_v5 = vrot.slane %v424_v59, %v1428_v6  ;;  %524 = vst [vmem:[#allocation2 + $0x58] sm:$0xff] %v508_v61  ;;  %525 = vst [vmem:[#allocation2 + $0x18] sm:$0xff] %v509_v62  ;;  %v473_v8 = vrot.slane %v421_v51, %v1428_v6  ;;  %v477_v9 = vrot.slane %v423_v52, %v1426_v4 }
  0x32   : > { %531 = vst [vmem:[#allocation2 + $0x20] sm:$0xff] %v515_v63  ;;  %v516_v7 = vmul.f32 %v469_v0, %v346_v39  ;;  %v481_v10 = vrot.slane %v423_v52, %v1428_v6  ;;  %526 = vst [vmem:[#allocation2 + $0x50] sm:$0xff] %v510_v1  ;;  %v512_v11 = vmul.f32 %v453_v3, %v346_v39 }
  0x33   : > { %527 = vst [vmem:[#allocation2 + $0x68] sm:$0xff] %v511_v2  ;;  %v513_v12 = vmul.f32 %v457_v5, %v347_v40  ;;  %v425_v13 = vcombine.high %v421_v51, %v421_v51  ;;  %v517_v14 = vmul.f32 %v473_v8, %v347_v40  ;;  %v518_v15 = vmul.f32 %v477_v9, %v346_v39 }
  0x34   : > { %532 = vst [vmem:[#allocation2 + $0x10] sm:$0xff] %v516_v7  ;;  %v519_v16 = vmul.f32 %v481_v10, %v347_v40  ;;  %528 = vst [vmem:[#allocation2 + $0x8] sm:$0xff] %v512_v11 }
  0x35   : > { %529 = vst [vmem:[#allocation2 + $0x48] sm:$0xff] %v513_v12  ;;  %v485_v17 = vrot.slane %v425_v13, %v1426_v4  ;;  %v489_v18 = vrot.slane %v425_v13, %v1428_v6  ;;  %533 = vst [vmem:[#allocation2 + $0x38] sm:$0xff] %v517_v14 }
  0x36   : > { %534 = vst [vmem:[#allocation2 + $0x60] sm:$0xff] %v518_v15  ;;  %535 = vst [vmem:[#allocation2 + $0x70] sm:$0xff] %v519_v16 }
  0x37   : > { %v520_v19 = vmul.f32 %v485_v17, %v346_v39  ;;  %v521_v20 = vmul.f32 %v489_v18, %v347_v40 }
  0x39   : > { %536 = vst [vmem:[#allocation2 + $0x78] sm:$0xff] %v520_v19  ;;  %537 = vst [vmem:[#allocation2 + $0x28] sm:$0xff] %v521_v20 }
  0x3a PF: > { %v663_v6 = vld [vmem:[#allocation2 + $0x20] sm:$0xff]  ;;  %v659_v29 = vld [vmem:[#allocation2 + $0x68] sm:$0xff]  ;;  %v658_v30 = vld [vmem:[#allocation2 + $0x50] sm:$0xff]  ;;  %vm670_vm0 = vcmask 523264   ;;  %v1359_v37 = vmov 0.0   ;;  %v553_v63 = vlaneseq  ;;  %vm1113_vm9 = vcmask 1041409  }
  0x3b   : > { %v664_v4 = vld [vmem:[#allocation2 + $0x10] sm:$0xff]  ;;  %v662_v26 = vld [vmem:[#allocation2 + $0x40] sm:$0xff]  ;;  %v660_v28 = vld [vmem:[#allocation2 + $0x8] sm:$0xff]  ;;  %771 = vmatprep.mubr.f32.mxu0 %v1359_v37  ;;  %807 = vmatprep.mubr.f32.mxu1 %v1359_v37  ;;  %vm1115_vm10 = vcmask 1045509   ;;  %vm1118_vm11 = vcmask 1042434   ;;  %vm1120_vm12 = vcmask 1046534  }
  0x3c   : > { %v665_v25 = vld [vmem:[#allocation2 + $0x38] sm:$0xff]  ;;  %v661_v27 = vld [vmem:[#allocation2 + $0x48] sm:$0xff]  ;;  %v655_v33 = vld [vmem:[#allocation2] sm:$0xff]  ;;  %v1489_v2 = vshrl.u32 %v553_v63, 7 }
  0x3d   : > { %v667_v23 = vld [vmem:[#allocation2 + $0x70] sm:$0xff]  ;;  %v666_v24 = vld [vmem:[#allocation2 + $0x60] sm:$0xff]  ;;  %v657_v31 = vld [vmem:[#allocation2 + $0x18] sm:$0xff] }
  0x3e   : > { %v656_v32 = vld [vmem:[#allocation2 + $0x58] sm:$0xff]  ;;  %v654_v34 = vld [vmem:[#allocation2 + $0x30] sm:$0xff]  ;;  %v538_v35 = vld [vmem:[%s1411_s28] sm:$0xff]  ;;  %v1492_v14 = vsub.s32 0, %v1489_v2  ;;  %v1495_v18 = vsub.s32 1, %v1489_v2  ;;  %v555_v19 = vcvt.s32.f32 %v1489_v2 }
  0x3f   : > { %v544_v36 = vld [vmem:[%s1411_s28 + $0x30] sm:$0xff]  ;;  %v539_v38 = vld [vmem:[%s1411_s28 + $0x8] sm:$0xff]  ;;  %v545_v39 = vld [vmem:[%s1411_s28 + $0x38] sm:$0xff] }
  0x40   : > { %v669_v21 = vld [vmem:[#allocation2 + $0x28] sm:$0xff]  ;;  %v668_v22 = vld [vmem:[#allocation2 + $0x78] sm:$0xff]  ;;  %v540_v40 = vld [vmem:[%s1411_s28 + $0x10] sm:$0xff] }
  0x41   : > { %723 = vmatprep.subr.mxu0 %v669_v21  ;;  %1287 = vmatprep.subr.mxu1 %v669_v21  ;;  %v546_v41 = vld [vmem:[%s1411_s28 + $0x40] sm:$0xff]  ;;  %v541_v42 = vld [vmem:[%s1411_s28 + $0x18] sm:$0xff]  ;;  %v547_v43 = vld [vmem:[%s1411_s28 + $0x48] sm:$0xff] }
  0x42   : > { %724 = vmatpush1.msra.mxu0 %v668_v22  ;;  %1295 = vmatpush1.msra.mxu1 %v668_v22  ;;  %v542_v44 = vld [vmem:[%s1411_s28 + $0x20] sm:$0xff]  ;;  %v548_v45 = vld [vmem:[%s1411_s28 + $0x50] sm:$0xff]  ;;  %v543_v46 = vld [vmem:[%s1411_s28 + $0x28] sm:$0xff] }
  0x43   : > { %725 = vmatprep.subr.mxu0 %v667_v23  ;;  %1288 = vmatprep.subr.mxu1 %v667_v23  ;;  %v549_v47 = vld [vmem:[%s1411_s28 + $0x58] sm:$0xff]  ;;  %v550_v48 = vld [vmem:[%s1406_s24] sm:$0x3] }
  0x44   : > { %726 = vmatpush1.msra.mxu0 %v666_v24  ;;  %1296 = vmatpush1.msra.mxu1 %v666_v24  ;;  %v552_v49 = vmul.f32 8.0, %v550_v48 }
  0x45   : > { %727 = vmatprep.subr.mxu0 %v665_v25  ;;  %1289 = vmatprep.subr.mxu1 %v665_v25 }
  0x46   : > { %728 = vmatpush1.msra.mxu0 %v664_v4  ;;  %1297 = vmatpush1.msra.mxu1 %v664_v4  ;;  %v1266_v50 = vadd.f32 -0.5, %v552_v49 }
  0x47   : > { %729 = vmatprep.subr.mxu0 %v663_v6  ;;  %1290 = vmatprep.subr.mxu1 %v663_v6 }
  0x48   : > { %730 = vmatpush1.msra.mxu0 %v662_v26  ;;  %1298 = vmatpush1.msra.mxu1 %v662_v26  ;;  %v557_v51 = vfloor.f32 %v1266_v50 }
  0x49   : > { %731 = vmatprep.subr.mxu0 %v661_v27  ;;  %1291 = vmatprep.subr.mxu1 %v661_v27 }
  0x4a   : > { %732 = vmatpush1.msra.mxu0 %v660_v28  ;;  %1299 = vmatpush1.msra.mxu1 %v660_v28  ;;  %v606_v52 = vadd.f32 1.0, %v557_v51  ;;  %v559_v53 = vadd.f32 0.5, %v557_v51  ;;  %v572_v5 = vmax.f32 %v557_v51, 0.0  ;;  %v1075_v51 = vsub.s32 2, %v1489_v2 }
  0x4b   : > { %733 = vmatprep.subr.mxu0 %v659_v29  ;;  %1292 = vmatprep.subr.mxu1 %v659_v29 }
  0x4c   : > { %734 = vmatpush1.msra.mxu0 %v658_v30  ;;  %1300 = vmatpush1.msra.mxu1 %v658_v30  ;;  %v607_v54 = vadd.f32 0.5, %v606_v52  ;;  %v560_v55 = vsub.f32 %v559_v53, %v552_v49  ;;  %v620_v8 = vmax.f32 %v606_v52, 0.0  ;;  %v573_v13 = vmin.f32 %v572_v5, 7.0 }
  0x4d   : > { %735 = vmatprep.subr.mxu0 %v657_v31  ;;  %1293 = vmatprep.subr.mxu1 %v657_v31 }
  0x4e   : > { %736 = vmatpush1.msra.mxu0 %v656_v32  ;;  %1301 = vmatpush1.msra.mxu1 %v656_v32  ;;  %v608_v56 = vsub.f32 %v607_v54, %v552_v49  ;;  %v561_v57 = vmul.f32 %v560_v55, %v560_v55  ;;  %v621_v15 = vmin.f32 %v620_v8, 7.0  ;;  %v578_v20 = vrot.slane %v573_v13, %v1492_v14 }
  0x4f   : > { %737 = vmatprep.subr.mxu0 %v655_v33  ;;  %1294 = vmatprep.subr.mxu1 %v655_v33  ;;  %v582_v24 = vrot.slane %v573_v13, %v1495_v18 }
  0x50   : > { %738 = vmatpush1.msra.mxu0 %v654_v34  ;;  %1302 = vmatpush1.msra.mxu1 %v654_v34  ;;  %v609_v58 = vmul.f32 %v608_v56, %v608_v56  ;;  %v562_v59 = vadd.f32 1e-08, %v561_v57  ;;  %v626_v21 = vrot.slane %v621_v15, %v1492_v14  ;;  %v630_v25 = vrot.slane %v621_v15, %v1495_v18 }
  0x51   : > { %1271 = vmatmul.mubr.msk.f32.vlgmr.msra.gmra.mxu0 %vm670_vm0, %v538_v35  ;;  %1277 = vmatmul.mubr.msk.f32.vlgmr.msra.gmra.mxu1 %vm670_vm0, %v544_v36  ;;  %vm585_vm5 = vcmp.eq.f32.partialorder %v555_v19, %v578_v20  ;;  %vm586_vm7 = vcmp.eq.f32.partialorder %v555_v19, %v582_v24  ;;  %v1049_v20 = vsub.s32 5, %v1489_v2 }
  0x52   : > { %777 = vmatprep.mubr.f32.mxu0 %v1359_v37  ;;  %813 = vmatprep.mubr.f32.mxu1 %v1359_v37  ;;  %v610_v60 = vadd.f32 1e-08, %v609_v58  ;;  %1330 = vrsqrt.f32 %v562_v59  ;;  %vm565_vm1 = vcmp.eq.f32.partialorder %v562_v59, inf  ;;  %v568_v3 = vand.u32 2147483648, %v562_v59 }
  0x53   : > { %vm567_vm3 = vcmp.eq.f32.partialorder %v562_v59, 0.0  ;;  %vm633_vm6 = vcmp.eq.f32.partialorder %v555_v19, %v626_v21  ;;  %vm634_vm8 = vcmp.eq.f32.partialorder %v555_v19, %v630_v25  ;;  %v1267_v26 = vsel %vm585_vm5, 1.0, %v1359_v37 }
  0x54   : > { %1332 = vrsqrt.f32 %v610_v60  ;;  %vm613_vm2 = vcmp.eq.f32.partialorder %v610_v60, inf  ;;  %v616_v7 = vand.u32 2147483648, %v610_v60  ;;  %vm615_vm4 = vcmp.eq.f32.partialorder %v610_v60, 0.0 }
  0x55   : > { %1272 = vmatmul.mubr.msk.f32.gmra.mxu0 %vm670_vm0, %v539_v38  ;;  %1278 = vmatmul.mubr.msk.f32.gmra.mxu1 %vm670_vm0, %v545_v39  ;;  %v1269_v27 = vsel %vm633_vm6, 1.0, %v1359_v37  ;;  %v1268_v30 = vsel %vm586_vm7, 1.0, %v1359_v37  ;;  %v1270_v31 = vsel %vm634_vm8, 1.0, %v1359_v37  ;;  %v1019_v58 = vsub.s32 4, %v1489_v2 }
  0x56   : > { %783 = vmatprep.mubr.f32.mxu0 %v1359_v37  ;;  %819 = vmatprep.mubr.f32.mxu1 %v1359_v37 }
  0x59   : > { %1273 = vmatmul.mubr.msk.f32.gmra.mxu0 %vm670_vm0, %v540_v40  ;;  %1279 = vmatmul.mubr.msk.f32.gmra.mxu1 %vm670_vm0, %v546_v41 }
  0x5a   : > { %789 = vmatprep.mubr.f32.mxu0 %v1359_v37  ;;  %825 = vmatprep.mubr.f32.mxu1 %v1359_v37 }
  0x5d   : > { %1274 = vmatmul.mubr.msk.f32.gmra.mxu0 %vm670_vm0, %v541_v42  ;;  %1280 = vmatmul.mubr.msk.f32.gmra.mxu1 %vm670_vm0, %v547_v43 }
  0x5e   : > { %795 = vmatprep.mubr.f32.mxu0 %v1359_v37  ;;  %831 = vmatprep.mubr.f32.mxu1 %v1359_v37 }
  0x5f   : > { %v1331_v61 = vpop.eup %1330 }
  0x60   : > { %v564_v0 = vmul.f32 %v1331_v61, %v562_v59 }
  0x61   : > { %1275 = vmatmul.mubr.msk.f32.gmra.mxu0 %vm670_vm0, %v542_v44  ;;  %1281 = vmatmul.mubr.msk.f32.gmra.mxu1 %vm670_vm0, %v548_v45  ;;  %v1333_v62 = vpop.eup %1332 }
  0x62   : > { %801 = vmatprep.mubr.f32.mxu0 %v1359_v37  ;;  %837 = vmatprep.mubr.f32.mxu1 %v1359_v37  ;;  %v612_v1 = vmul.f32 %v1333_v62, %v610_v60  ;;  %v566_v9 = vsel %vm565_vm1, %v562_v59, %v564_v0 }
  0x63   : > { %v569_v11 = vsel %vm567_vm3, %v568_v3, %v566_v9  ;;  %v1079_v3 = vsub.s32 6, %v1489_v2 }
  0x64   : > { %v614_v10 = vsel %vm613_vm2, %v610_v60, %v612_v1  ;;  %v570_v16 = vsub.f32 1.0, %v569_v11  ;;  %v551_v60 = vld [vmem:[%s1416_s5] sm:$0x77] }
  0x65   : > { %1276 = vmatmul.mubr.msk.f32.gmra.mxu0 %vm670_vm0, %v543_v46  ;;  %1282 = vmatmul.mubr.msk.f32.gmra.mxu1 %vm670_vm0, %v549_v47  ;;  %v617_v12 = vsel %vm615_vm4, %v616_v7, %v614_v10  ;;  %v1076_v13 = vrot.slane %v551_v60, %v1075_v51  ;;  %v1020_v15 = vrot.slane %v551_v60, %v1019_v58 }
  0x66   : > { %v618_v17 = vsub.f32 1.0, %v617_v12  ;;  %v571_v22 = vmax.f32 %v570_v16, 0.0  ;;  %v1016_v12 = vrot.slane %v551_v60, %v1492_v14 }
  0x68   : > { %v619_v23 = vmax.f32 %v618_v17, 0.0  ;;  %v595_v4 = vrot.slane %v571_v22, %v1492_v14  ;;  %v599_v28 = vrot.slane %v571_v22, %v1495_v18 }
  0x6a   : > { %v643_v6 = vrot.slane %v619_v23, %v1492_v14  ;;  %v647_v29 = vrot.slane %v619_v23, %v1495_v18  ;;  %v602_v32 = vmul.f32 %v1267_v26, %v595_v4  ;;  %v603_v34 = vmul.f32 %v1268_v30, %v599_v28 }
  0x6b   : > { %v1080_v4 = vrot.slane %v551_v60, %v1079_v3  ;;  %v1531_v28 = vrot.slane %v1076_v13, %v1075_v51  ;;  %v1046_v30 = vrot.slane %v551_v60, %v1495_v18 }
  0x6c   : > { %v650_v33 = vmul.f32 %v1269_v27, %v643_v6  ;;  %v651_v35 = vmul.f32 %v1270_v31, %v647_v29  ;;  %v1529_v27 = vrot.slane %v1016_v12, %v1492_v14  ;;  %v1534_v29 = vrot.slane %v1020_v15, %v1492_v14 }
  0x6e   : > { %v1510_v36 = vadd.f32 %v650_v33, %v602_v32  ;;  %v1512_v38 = vadd.f32 %v651_v35, %v603_v34  ;;  %v1050_v33 = vrot.slane %v551_v60, %v1049_v20 }
 0x111   : > { %v773_v39 = vpop.f32.mrf.mxu0  ;;  %v809_v40 = vpop.f32.mrf.mxu1 }
 0x112   : > { %v844_v41 = vmul.f32 %v773_v39, %v1510_v36  ;;  %v856_v45 = vmul.f32 %v809_v40, %v1510_v36 }
 0x113   : > { %v775_v42 = vpop.f32.mrf.mxu0  ;;  %v811_v43 = vpop.f32.mrf.mxu1 }
 0x114   : > { %v868_v44 = vrot.slane %v844_v41, 4  ;;  %v845_v37 = vmul.f32 %v775_v42, %v1512_v38  ;;  %v857_v46 = vmul.f32 %v811_v43, %v1512_v38  ;;  %v940_v57 = vrot.slane %v856_v45, 4 }
 0x115   : > { %v779_v47 = vpop.f32.mrf.mxu0  ;;  %v815_v48 = vpop.f32.mrf.mxu1 }
 0x116   : > { %v869_v49 = vadd.f32 %v868_v44, %v844_v41  ;;  %v874_v50 = vrot.slane %v845_v37, 4  ;;  %v846_v52 = vmul.f32 %v779_v47, %v1510_v36  ;;  %v858_v53 = vmul.f32 %v815_v48, %v1510_v36 }
 0x117   : > { %v781_v54 = vpop.f32.mrf.mxu0  ;;  %v817_v55 = vpop.f32.mrf.mxu1  ;;  %v946_v59 = vrot.slane %v857_v46, 4  ;;  %v941_v17 = vadd.f32 %v940_v57, %v856_v45  ;;  %v1539_v44 = vrot.slane %v1080_v4, %v1075_v51 }
 0x118   : > { %v870_v56 = vrot.slane %v869_v49, 2  ;;  %v880_v61 = vrot.slane %v846_v52, 4  ;;  %v952_v62 = vrot.slane %v858_v53, 4  ;;  %v847_v63 = vmul.f32 %v781_v54, %v1512_v38 }
 0x119   : > { %v859_v0 = vmul.f32 %v817_v55, %v1512_v38  ;;  %v875_v1 = vadd.f32 %v874_v50, %v845_v37  ;;  %v785_v5 = vpop.f32.mrf.mxu0  ;;  %v821_v7 = vpop.f32.mrf.mxu1  ;;  %v947_v19 = vadd.f32 %v946_v59, %v857_v46  ;;  %v942_v2 = vrot.slane %v941_v17, 2 }
 0x11a   : > { %v881_v8 = vadd.f32 %v880_v61, %v846_v52  ;;  %v953_v9 = vadd.f32 %v952_v62, %v858_v53  ;;  %v886_v10 = vrot.slane %v847_v63, 4  ;;  %v871_v16 = vadd.f32 %v870_v56, %v869_v49 }
 0x11b   : > { %v958_v11 = vrot.slane %v859_v0, 4  ;;  %v787_v23 = vpop.f32.mrf.mxu0  ;;  %v823_v24 = vpop.f32.mrf.mxu1  ;;  %v876_v25 = vrot.slane %v875_v1, 2  ;;  %v948_v32 = vrot.slane %v947_v19, 2  ;;  %v848_v39 = vmul.f32 %v785_v5, %v1510_v36 }
 0x11c   : > { %v887_v21 = vadd.f32 %v886_v10, %v847_v63  ;;  %v882_v6 = vrot.slane %v881_v8, 2  ;;  %v954_v26 = vrot.slane %v953_v9, 2  ;;  %v872_v31 = vrot.slane %v871_v16, 1 }
 0x11d   : > { %v959_v22 = vadd.f32 %v958_v11, %v859_v0  ;;  %v860_v40 = vmul.f32 %v821_v7, %v1510_v36  ;;  %v791_v41 = vpop.f32.mrf.mxu0  ;;  %v827_v42 = vpop.f32.mrf.mxu1  ;;  %v877_v43 = vadd.f32 %v876_v25, %v875_v1  ;;  %v892_v37 = vrot.slane %v848_v39, 4 }
 0x11e   : > { %v888_v34 = vrot.slane %v887_v21, 2  ;;  %v883_v45 = vadd.f32 %v882_v6, %v881_v8  ;;  %v955_v14 = vadd.f32 %v954_v26, %v953_v9  ;;  %v849_v47 = vmul.f32 %v787_v23, %v1512_v38 }
 0x11f   : > { %v960_v35 = vrot.slane %v959_v22, 2  ;;  %v964_v46 = vrot.slane %v860_v40, 4  ;;  %v861_v48 = vmul.f32 %v823_v24, %v1512_v38  ;;  %v1543_v49 = vadd.f32 %v942_v2, %v941_v17  ;;  %v793_v57 = vpop.f32.mrf.mxu0  ;;  %v829_v58 = vpop.f32.mrf.mxu1 }
 0x120   : > { %v949_v50 = vadd.f32 %v948_v32, %v947_v19  ;;  %v1546_v52 = vrot.slane %v1046_v30, %v1495_v18  ;;  %v1549_v53 = vrot.slane %v1050_v33, %v1495_v18  ;;  %v873_v54 = vadd.f32 %v872_v31, %v871_v16 }
 0x121   : > { %v889_v51 = vadd.f32 %v888_v34, %v887_v21  ;;  %v961_v55 = vadd.f32 %v960_v35, %v959_v22  ;;  %v893_v56 = vadd.f32 %v892_v37, %v848_v39  ;;  %v878_v59 = vrot.slane %v877_v43, 1  ;;  %v797_v23 = vpop.f32.mrf.mxu0  ;;  %v833_v26 = vpop.f32.mrf.mxu1 }
 0x122   : > { %v965_v60 = vadd.f32 %v964_v46, %v860_v40  ;;  %v850_v61 = vmul.f32 %v791_v41, %v1510_v36  ;;  %v862_v62 = vmul.f32 %v827_v42, %v1510_v36  ;;  %v884_v63 = vrot.slane %v883_v45, 1 }
 0x123   : > { %v956_v0 = vrot.slane %v955_v14, 1  ;;  %v898_v1 = vrot.slane %v849_v47, 4  ;;  %v970_v3 = vrot.slane %v861_v48, 4  ;;  %v851_v18 = vmul.f32 %v793_v57, %v1512_v38 }
 0x124   : > { %v904_v5 = vrot.slane %v850_v61, 4  ;;  %v976_v7 = vrot.slane %v862_v62, 4  ;;  %v863_v8 = vmul.f32 %v829_v58, %v1512_v38  ;;  %v950_v9 = vrot.slane %v949_v50, 1 }
 0x125   : > { %v890_v10 = vrot.slane %v889_v51, 1  ;;  %v962_v11 = vrot.slane %v961_v55, 1  ;;  %v894_v12 = vrot.slane %v893_v56, 2  ;;  %v966_v13 = vrot.slane %v965_v60, 2 }
 0x126   : > { %v905_v15 = vadd.f32 %v904_v5, %v850_v61  ;;  %v910_v16 = vrot.slane %v851_v18, 4  ;;  %v982_v17 = vrot.slane %v863_v8, 4  ;;  %v879_v19 = vadd.f32 %v878_v59, %v877_v43 }
 0x127   : > { %v885_v20 = vadd.f32 %v884_v63, %v883_v45  ;;  %v957_v21 = vadd.f32 %v956_v0, %v955_v14  ;;  %v899_v22 = vadd.f32 %v898_v1, %v849_v47  ;;  %v971_v24 = vadd.f32 %v970_v3, %v861_v48  ;;  %v799_v45 = vpop.f32.mrf.mxu0  ;;  %v835_v48 = vpop.f32.mrf.mxu1 }
 0x128   : > { %v977_v25 = vadd.f32 %v976_v7, %v862_v62  ;;  %v911_v4 = vadd.f32 %v910_v16, %v851_v18  ;;  %v983_v6 = vadd.f32 %v982_v17, %v863_v8  ;;  %v1556_v30 = vmul.f32 %v1529_v27, %v873_v54 }
 0x129   : > { %v944_v31 = vrot.slane %v1543_v49, 1  ;;  %v891_v2 = vadd.f32 %v890_v10, %v889_v51  ;;  %v963_v32 = vadd.f32 %v962_v11, %v961_v55  ;;  %v895_v33 = vadd.f32 %v894_v12, %v893_v56  ;;  %v803_v0 = vpop.f32.mrf.mxu0  ;;  %v839_v11 = vpop.f32.mrf.mxu1 }
 0x12a   : > { %v1559_v34 = vadd.f32 %v966_v13, %v965_v60  ;;  %v906_v35 = vrot.slane %v905_v15, 2  ;;  %v912_v39 = vrot.slane %v911_v4, 2  ;;  %v1562_v40 = vmul.f32 %v1534_v29, %v879_v19 }
 0x12b   : > { %v1564_v41 = vadd.f32 %v950_v9, %v949_v50  ;;  %v1567_v42 = vmul.f32 %v1529_v27, %v885_v20  ;;  %v1570_v43 = vmul.f32 %v1531_v28, %v957_v21  ;;  %v900_v14 = vrot.slane %v899_v22, 2 }
 0x12c   : > { %v972_v37 = vrot.slane %v971_v24, 2  ;;  %v978_v46 = vrot.slane %v977_v25, 2  ;;  %v984_v47 = vrot.slane %v983_v6, 2  ;;  %v1573_v54 = vmul.f32 %v1534_v29, %v891_v2 }
 0x12d   : > { %v1576_v51 = vmul.f32 %v1539_v44, %v963_v32  ;;  %v852_v50 = vmul.f32 %v797_v23, %v1510_v36  ;;  %v864_v55 = vmul.f32 %v833_v26, %v1510_v36  ;;  %v896_v56 = vrot.slane %v895_v33, 1 }
 0x12e   : > { %v968_v57 = vrot.slane %v1559_v34, 1  ;;  %v1581_v58 = vadd.f32 %v906_v35, %v905_v15  ;;  %v913_v59 = vadd.f32 %v912_v39, %v911_v4  ;;  %v853_v62 = vmul.f32 %v799_v45, %v1512_v38 }
 0x12f   : > { %v916_v60 = vrot.slane %v852_v50, 4  ;;  %v988_v61 = vrot.slane %v864_v55, 4  ;;  %v865_v63 = vmul.f32 %v835_v48, %v1512_v38  ;;  %v1585_v1 = vadd.f32 %v900_v14, %v899_v22  ;;  %v805_v22 = vpop.f32.mrf.mxu0  ;;  %v841_v48 = vpop.f32.mrf.mxu1 }
 0x130   : > { %v1587_v3 = vadd.f32 %v972_v37, %v971_v24  ;;  %v979_v5 = vadd.f32 %v978_v46, %v977_v25  ;;  %v985_v7 = vadd.f32 %v984_v47, %v983_v6  ;;  %v922_v9 = vrot.slane %v853_v62, 4 }
 0x131   : > { %v917_v18 = vadd.f32 %v916_v60, %v852_v50  ;;  %v989_v8 = vadd.f32 %v988_v61, %v864_v55  ;;  %v994_v10 = vrot.slane %v865_v63, 4  ;;  %v897_v12 = vadd.f32 %v896_v56, %v895_v33 }
 0x132   : > { %v908_v13 = vrot.slane %v1581_v58, 1  ;;  %v914_v15 = vrot.slane %v913_v59, 1  ;;  %v854_v16 = vmul.f32 %v803_v0, %v1510_v36  ;;  %v923_v20 = vadd.f32 %v922_v9, %v853_v62 }
 0x133   : > { %v918_v17 = vrot.slane %v917_v18, 2  ;;  %v990_v19 = vrot.slane %v989_v8, 2  ;;  %v995_v21 = vadd.f32 %v994_v10, %v865_v63  ;;  %v980_v23 = vrot.slane %v979_v5, 1 }
 0x134   : > { %v986_v24 = vrot.slane %v985_v7, 1  ;;  %v928_v25 = vrot.slane %v854_v16, 4  ;;  %v866_v4 = vmul.f32 %v839_v11, %v1510_v36  ;;  %v924_v2 = vrot.slane %v923_v20, 2 }
 0x135   : > { %v919_v6 = vadd.f32 %v918_v17, %v917_v18  ;;  %v991_v26 = vadd.f32 %v990_v19, %v989_v8  ;;  %v996_v32 = vrot.slane %v995_v21, 2  ;;  %v915_v33 = vadd.f32 %v914_v15, %v913_v59 }
 0x136   : > { %v929_v35 = vadd.f32 %v928_v25, %v854_v16  ;;  %v1000_v39 = vrot.slane %v866_v4, 4  ;;  %v855_v45 = vmul.f32 %v805_v22, %v1512_v38  ;;  %v925_v46 = vadd.f32 %v924_v2, %v923_v20 }
 0x137   : > { %v920_v14 = vrot.slane %v919_v6, 1  ;;  %v992_v37 = vrot.slane %v991_v26, 1  ;;  %v997_v47 = vadd.f32 %v996_v32, %v995_v21  ;;  %v987_v50 = vadd.f32 %v986_v24, %v985_v7 }
 0x138   : > { %v930_v55 = vrot.slane %v929_v35, 2  ;;  %v1001_v56 = vadd.f32 %v1000_v39, %v866_v4  ;;  %v934_v60 = vrot.slane %v855_v45, 4  ;;  %v926_v62 = vrot.slane %v925_v46, 1 }
 0x139   : > { %v921_v61 = vadd.f32 %v920_v14, %v919_v6  ;;  %v993_v36 = vadd.f32 %v992_v37, %v991_v26  ;;  %v998_v63 = vrot.slane %v997_v47, 1  ;;  %v867_v8 = vmul.f32 %v841_v48, %v1512_v38 }
 0x13a   : > { %v931_v0 = vadd.f32 %v930_v55, %v929_v35  ;;  %v1002_v18 = vrot.slane %v1001_v56, 2  ;;  %v935_v59 = vadd.f32 %v934_v60, %v855_v45  ;;  %v927_v11 = vadd.f32 %v926_v62, %v925_v46 }
 0x13b   : > { %v1063_v9 = vmul.f32 %v1546_v52, %v921_v61  ;;  %v1039_v10 = vadd.f32 %v1567_v42, %v993_v36  ;;  %v999_v15 = vadd.f32 %v998_v63, %v997_v47  ;;  %v1006_v19 = vrot.slane %v867_v8, 4 }
 0x13c   : > { %v932_v16 = vrot.slane %v931_v0, 1  ;;  %v1003_v7 = vadd.f32 %v1002_v18, %v1001_v56  ;;  %v936_v17 = vrot.slane %v935_v59, 2  ;;  %v902_v20 = vrot.slane %v1585_v1, 1 }
 0x13d   : > { %v909_v21 = vadd.f32 %v908_v13, %v1581_v58  ;;  %v1064_v22 = vmul.f32 %v1549_v53, %v927_v11  ;;  %v1040_v24 = vadd.f32 %v1573_v54, %v999_v15  ;;  %v981_v25 = vadd.f32 %v980_v23, %v979_v5 }
 0x13e   : > { %v1004_v38 = vrot.slane %v1003_v7, 1  ;;  %v937_v4 = vadd.f32 %v936_v17, %v935_v59  ;;  %v1007_v6 = vadd.f32 %v1006_v19, %v867_v8  ;;  %v1062_v42 = vmul.f32 %v1549_v53, %v915_v33 }
 0x13f   : > { %v1038_v26 = vadd.f32 %v1562_v40, %v987_v50  ;;  %v1069_v2 = vadd.f32 %v1063_v9, %v1039_v10  ;;  %v1070_v32 = vadd.f32 %v1064_v22, %v1040_v24  ;;  %v933_v35 = vadd.f32 %v932_v16, %v931_v0 }
 0x140   : > { %v1005_v39 = vadd.f32 %v1004_v38, %v1003_v7  ;;  %v938_v45 = vrot.slane %v937_v4, 1  ;;  %v1008_v14 = vrot.slane %v1007_v6, 2  ;;  %v1035_v58 = vmul.f32 %v1529_v27, %v897_v12 }
 0x141   : > { %v903_v13 = vadd.f32 %v902_v20, %v1585_v1  ;;  %v974_v54 = vrot.slane %v1587_v3, 1  ;;  %v1061_v5 = vmul.f32 %v1546_v52, %v909_v21  ;;  %v1037_v23 = vadd.f32 %v1556_v30, %v981_v25 }
 0x142   : > { %v1100_v33 = vadd.f32 %v1576_v51, %v1070_v32  ;;  %v939_v37 = vadd.f32 %v938_v45, %v937_v4  ;;  %v1009_v40 = vadd.f32 %v1008_v14, %v1007_v6  ;;  %v945_v46 = vadd.f32 %v944_v31, %v1543_v49 }
 0x143   : > { %v1068_v47 = vadd.f32 %v1062_v42, %v1038_v26  ;;  %v1099_v48 = vadd.f32 %v1570_v43, %v1069_v2  ;;  %v1065_v27 = vmul.f32 %v1546_v52, %v933_v35  ;;  %v1041_v1 = vadd.f32 %v1035_v58, %v1005_v39 }
 0x144   : > { %v1010_v12 = vrot.slane %v1009_v40, 1  ;;  %v1092_v50 = vmul.f32 %v1539_v44, %v1564_v41  ;;  %v969_v30 = vadd.f32 %v968_v57, %v1559_v34  ;;  %v1036_v51 = vmul.f32 %v1534_v29, %v903_v13 }
 0x145   : > { %v975_v55 = vadd.f32 %v974_v54, %v1587_v3  ;;  %v1067_v56 = vadd.f32 %v1061_v5, %v1037_v23  ;;  %v1110_v49 = vcombine.low %v1099_v48, %v1100_v33  ;;  %v1066_v31 = vmul.f32 %v1549_v53, %v939_v37 }
 0x146   : > { %v1011_v43 = vadd.f32 %v1010_v12, %v1009_v40  ;;  %v1091_v52 = vmul.f32 %v1531_v28, %v945_v46  ;;  %v1098_v60 = vadd.f32 %v1092_v50, %v1068_v47  ;;  %v1071_v61 = vadd.f32 %v1065_v27, %v1041_v1 }
 0x147   : > { %v1095_v41 = vmul.f32 %v1531_v28, %v969_v30  ;;  %v1096_v62 = vmul.f32 %v1539_v44, %v975_v55  ;;  %v1112_v34 = vrot.slane %v1110_v49, 7 }
 0x148   : > { %v1042_v36 = vadd.f32 %v1036_v51, %v1011_v43  ;;  %v1097_v63 = vadd.f32 %v1091_v52, %v1067_v56 }
 0x149   : > { %v1101_v3 = vadd.f32 %v1095_v41, %v1071_v61 }
 0x14a   : > { %v1072_v29 = vadd.f32 %v1066_v31, %v1042_v36  ;;  %v1109_v57 = vcombine.low %v1097_v63, %v1098_v60 }
 0x14c   : > { %v1102_v0 = vadd.f32 %v1096_v62, %v1072_v29  ;;  %v1114_v18 = vsel %vm1113_vm9, %v1112_v34, %v1109_v57 }
 0x14d   : > { %v1116_v8 = vsel %vm1115_vm10, %v1112_v34, %v1114_v18 }
 0x14e   : > { %v1111_v53 = vcombine.low %v1101_v3, %v1102_v0 }
 0x150   : > { %v1117_v59 = vrot.slane %v1111_v53, 6 }
 0x152   : > { %v1119_v9 = vsel %vm1118_vm11, %v1117_v59, %v1116_v8 }
 0x153   : > { %v1121_v10 = vsel %vm1120_vm12, %v1117_v59, %v1119_v9 }
 0x154   : > { %1123 = vst [vmem:[%s1421_s8] sm:$0x77] %v1121_v10 }
 0x155 PF: > { %s14_s17 = sadd.s32 1, %s1356_s17   ;;  %s1639_s15 = smov %s1352_s16 }
 0x156   : > { %p11_p6 = scmp.ge.s32.totalorder %s14_s17, 4   ;;  %s1640_s16 = smov %s1642_s18 }
 0x158   :  { %13 = sbr.rel (!%p11_p6) target bundleno = 2 (0x2), region = 79 }

</bundles_post_ra>
